<compile_context>
chip_gen: v6e
topology: v6e:2x2x1
jax: 0.10.0
libtpu: 0.0.40
codegen_flags: <defaults>
</compile_context>

<pallas_src>
import functools

import jax
import jax.numpy as jnp
from jax.experimental import pallas as pl
from jax.experimental.pallas import tpu as pltpu

_MIB = 1024 * 1024


def _round_up(x, k):
    return (x + k - 1) // k * k


# -----------------------------------------------------------------------------
# Kernels
# -----------------------------------------------------------------------------
def _store_partial(out_ref, total):
    """Single unmasked, lane-dense full-block store; partial sum lands at [0, 0]."""
    r = jax.lax.broadcasted_iota(jnp.int32, out_ref.shape, 0)
    c = jax.lax.broadcasted_iota(jnp.int32, out_ref.shape, 1)
    out_ref[...] = jnp.where((r == 0) & (c == 0), total, 0.0).astype(out_ref.dtype)


def _row_mask(i, tile_rows, n_rows):
    row = i * tile_rows + jax.lax.broadcasted_iota(jnp.int32, (tile_rows, 1), 0)
    return row < n_rows


def _triplet_dense_kernel(x_ref, out_ref, *, epsilon, m, d, n_rows, tile_rows):
    """Lane-dense layout: block is (tile_rows, 3*d); a/p/n are aligned lane slices."""
    i = pl.program_id(0)
    x = x_ref[...]                                   # native dtype, no block upcast
    anchor = x[:, 0:d]
    positive = x[:, d:2 * d]
    negative = x[:, 2 * d:3 * d]

    d_ap = (anchor - positive).astype(jnp.float32)   # promote only the diffs
    d_an = (anchor - negative).astype(jnp.float32)
    maximize = jnp.sum(d_ap * d_ap, axis=-1, keepdims=True)   # (tile_rows, 1)
    minimize = jnp.sum(d_an * d_an, axis=-1, keepdims=True)

    parts = jnp.sqrt(maximize + epsilon) - jnp.sqrt(minimize + epsilon) + m
    loss = jnp.maximum(parts, 0.0)
    loss = jnp.where(_row_mask(i, tile_rows, n_rows), loss, 0.0)
    _store_partial(out_ref, jnp.sum(loss))


def _triplet_3d_kernel(x_ref, out_ref, *, epsilon, m, n_rows, tile_rows):
    """Fallback layout for d % 128 != 0: block is (tile_rows, 3, d)."""
    i = pl.program_id(0)
    x = x_ref[...]
    d_ap = (x[:, 0, :] - x[:, 1, :]).astype(jnp.float32)
    d_an = (x[:, 0, :] - x[:, 2, :]).astype(jnp.float32)
    maximize = jnp.sum(d_ap * d_ap, axis=-1, keepdims=True)
    minimize = jnp.sum(d_an * d_an, axis=-1, keepdims=True)

    parts = jnp.sqrt(maximize + epsilon) - jnp.sqrt(minimize + epsilon) + m
    loss = jnp.maximum(parts, 0.0)
    loss = jnp.where(_row_mask(i, tile_rows, n_rows), loss, 0.0)
    _store_partial(out_ref, jnp.sum(loss))


# -----------------------------------------------------------------------------
# Tile sizing
# -----------------------------------------------------------------------------
def _block_budget_bytes():
    """Per-block data target (memory-bound kernel): ~HBM_BW * 3-4 us per step."""
    try:
        kind = jax.devices()[0].device_kind.lower()
    except Exception:
        kind = ""
    if "v7" in kind:
        return 12 * _MIB
    if "v6" in kind:
        return 5 * _MIB
    if "v5" in kind:
        return 3 * _MIB
    return 4 * _MIB


def _bytes_per_row(d, itemsize, dense):
    if dense:
        # Lane-dense (tile_rows, 3*d) block: 3*d is already a lane multiple.
        return 3 * d * itemsize
    # (tile_rows, 3, d) block: size-3 dim pads to a full sublane group and d
    # pads to a lane multiple -> ~32 * round_up(d, 128) bytes/row for any dtype.
    return 8 * _round_up(d, 128) * 4


def _choose_tile_rows(n, d, itemsize, dense):
    budget = _block_budget_bytes()
    bpr = _bytes_per_row(d, itemsize, dense)
    tile = max(8, (budget // bpr) // 8 * 8)
    # Keep at least 2 grid steps: feeds both v7x TensorCores ("parallel" axis)
    # and gives the input pipeline something to double-buffer.
    tile = min(tile, _round_up(pl.cdiv(n, 2), 8))
    return int(max(1, min(n, tile)))


# -----------------------------------------------------------------------------
# Wrapper
# -----------------------------------------------------------------------------
def triplet_loss(features, epsilon: float = 1e-06, m: float = 2.0, tile_rows=None):
    """Pallas implementation of TripletLoss.forward.

    features: (n, 3, d) array (any float dtype). Returns scalar float32 mean loss.
    A 2-D input returns 0, matching the PyTorch module.
    """
    if features.ndim == 2:
        return jnp.float32(0.0)

    n, three, d = features.shape
    assert three == 3, "features must have shape (n, 3, d)"
    itemsize = jnp.dtype(features.dtype).itemsize
    dense = (d % 128 == 0)

    if tile_rows is None:
        tile_rows = _choose_tile_rows(n, d, itemsize, dense)
    tile_rows = int(max(1, min(int(tile_rows), n)))
    if tile_rows < n:
        # (8,128) rule: a non-full leading dim of the lane-dense 2-D block must
        # be a multiple of 8 (harmless for the 3-D fallback layout too).
        tile_rows = max(8, (tile_rows // 8) * 8)
        if tile_rows >= n:
            tile_rows = n
    grid_n = pl.cdiv(n, tile_rows)

    block_bytes = tile_rows * _bytes_per_row(d, itemsize, dense)
    # Double-buffered input + output blocks + headroom; 48 MiB cap fits v7x.
    vmem_limit = int(min(48 * _MIB, max(32 * _MIB, 2 * block_bytes + 4 * _MIB)))

    cost = pl.CostEstimate(
        flops=int(4 * n * d + 6 * n),
        transcendentals=int(2 * n),
        bytes_accessed=int(n * 3 * d * itemsize + grid_n * 8 * 128 * 4),
    )

    if dense:
        kernel = functools.partial(
            _triplet_dense_kernel, epsilon=float(epsilon), m=float(m),
            d=d, n_rows=n, tile_rows=tile_rows)
        x = features.reshape(n, 3 * d)            # contiguous collapse, no copy
        in_spec = pl.BlockSpec((tile_rows, 3 * d), lambda i: (i, 0))
    else:
        kernel = functools.partial(
            _triplet_3d_kernel, epsilon=float(epsilon), m=float(m),
            n_rows=n, tile_rows=tile_rows)
        x = features
        in_spec = pl.BlockSpec((tile_rows, 3, d), lambda i: (i, 0, 0))

    partials = pl.pallas_call(
        kernel,
        out_shape=jax.ShapeDtypeStruct((grid_n * 8, 128), jnp.float32),
        grid=(grid_n,),
        in_specs=[in_spec],
        out_specs=pl.BlockSpec((8, 128), lambda i: (i, 0)),
        compiler_params=pltpu.CompilerParams(
            dimension_semantics=("parallel",),
            vmem_limit_bytes=vmem_limit,
        ),
        cost_estimate=cost,
    )(x)

    # Tiny final reduction of per-tile partial sums (only [0,0] of each block is
    # non-zero, so a full sum is exact), then the mean.
    return jnp.sum(partials) / jnp.float32(n)


def _reference(features, epsilon=1e-06, m=2.0):
    f = features.astype(jnp.float32)
    maximize = jnp.sum((f[:, 0, :] - f[:, 1, :]) ** 2, axis=-1)
    minimize = jnp.sum((f[:, 0, :] - f[:, 2, :]) ** 2, axis=-1)
    parts = jnp.sqrt(maximize + epsilon) - jnp.sqrt(minimize + epsilon) + m
    return jnp.mean(jnp.maximum(parts, 0.0))


if __name__ == "__main__":
    key = jax.random.PRNGKey(0)
    k1, k2, k3 = jax.random.split(key, 3)

    # Case 1: lane-dense path (d % 128 == 0), single tile, auto sizing.
    feats = jax.random.normal(k1, (8, 3, 128), dtype=jnp.float32)
    out = jax.block_until_ready(triplet_loss(feats))
    ref = _reference(feats)
    assert jnp.allclose(out, ref, atol=1e-4, rtol=1e-5), (out, ref)

    # Case 2: lane-dense path, ragged multi-tile grid (pipelining + tail mask).
    feats2 = jax.random.normal(k2, (37, 3, 128), dtype=jnp.float32)
    out2 = jax.block_until_ready(triplet_loss(feats2, tile_rows=16))
    ref2 = _reference(feats2)
    assert jnp.allclose(out2, ref2, atol=1e-4, rtol=1e-5), (out2, ref2)

    # Case 3: fallback (tile_rows, 3, d) path for d not a lane multiple.
    feats3 = jax.random.normal(k3, (24, 3, 32), dtype=jnp.float32)
    out3 = jax.block_until_ready(triplet_loss(feats3))
    ref3 = _reference(feats3)
    assert jnp.allclose(out3, ref3, atol=1e-4, rtol=1e-5), (out3, ref3)

    # 2-D input short-circuits to 0, like the PyTorch module.
    flat = jax.random.normal(k1, (8, 32), dtype=jnp.float32)
    assert float(triplet_loss(flat)) == 0.0

    print("KERNEL_OK")
</pallas_src>

<mosaic_0001>
module attributes {stable_mosaic.version = 11 : i64} {
  func.func @_triplet_dense_kernel(%arg0: i32, %arg1: memref<8x384xf32, #tpu.memory_space<vmem>>, %arg2: memref<8x128xf32, #tpu.memory_space<vmem>>) attributes {dimension_semantics = [#tpu.dimension_semantics<parallel>], iteration_bounds = array<i64: 1>, scalar_prefetch = 0 : i64, scratch_operands = 0 : i64, tpu.core_type = #tpu.core_type<tc>, window_params = [{transform_indices = @transform_0, window_bounds = array<i64: 8, 384>}, {transform_indices = @transform_1, window_bounds = array<i64: 8, 128>}]} {
    %c0 = arith.constant 0 : index
    %c0_0 = arith.constant 0 : index
    %0 = vector.load %arg1[%c0, %c0_0] : memref<8x384xf32, #tpu.memory_space<vmem>>, vector<8x384xf32>
    %1 = vector.extract_strided_slice %0 {offsets = [0, 0], sizes = [8, 128], strides = [1, 1]} : vector<8x384xf32> to vector<8x128xf32>
    %2 = vector.extract_strided_slice %0 {offsets = [0, 128], sizes = [8, 128], strides = [1, 1]} : vector<8x384xf32> to vector<8x128xf32>
    %3 = vector.extract_strided_slice %0 {offsets = [0, 256], sizes = [8, 128], strides = [1, 1]} : vector<8x384xf32> to vector<8x128xf32>
    %4 = arith.subf %1, %2 : vector<8x128xf32>
    %5 = arith.subf %1, %3 : vector<8x128xf32>
    %6 = arith.mulf %4, %4 : vector<8x128xf32>
    %cst = arith.constant dense<0.000000e+00> : vector<8xf32>
    %7 = vector.multi_reduction <add>, %6, %cst [1] : vector<8x128xf32> to vector<8xf32>
    %8 = vector.shape_cast %7 : vector<8xf32> to vector<8x1xf32>
    %9 = arith.mulf %5, %5 : vector<8x128xf32>
    %cst_1 = arith.constant dense<0.000000e+00> : vector<8xf32>
    %10 = vector.multi_reduction <add>, %9, %cst_1 [1] : vector<8x128xf32> to vector<8xf32>
    %11 = vector.shape_cast %10 : vector<8xf32> to vector<8x1xf32>
    %cst_2 = arith.constant 9.99999997E-7 : f32
    %12 = vector.broadcast %cst_2 : f32 to vector<8x1xf32>
    %13 = arith.addf %8, %12 : vector<8x1xf32>
    %14 = math.sqrt %13 : vector<8x1xf32>
    %cst_3 = arith.constant 9.99999997E-7 : f32
    %15 = vector.broadcast %cst_3 : f32 to vector<8x1xf32>
    %16 = arith.addf %11, %15 : vector<8x1xf32>
    %17 = math.sqrt %16 : vector<8x1xf32>
    %18 = arith.subf %14, %17 : vector<8x1xf32>
    %cst_4 = arith.constant 2.000000e+00 : f32
    %19 = vector.broadcast %cst_4 : f32 to vector<8x1xf32>
    %20 = arith.addf %18, %19 : vector<8x1xf32>
    %cst_5 = arith.constant 0.000000e+00 : f32
    %21 = vector.broadcast %cst_5 : f32 to vector<8x1xf32>
    %22 = arith.maximumf %20, %21 : vector<8x1xf32>
    %c8_i32 = arith.constant 8 : i32
    %23 = arith.muli %arg0, %c8_i32 : i32
    %24 = tpu.iota {dimensions = array<i32: 0>} : vector<8x1xi32>
    %25 = vector.broadcast %23 : i32 to vector<8x1xi32>
    %26 = arith.addi %25, %24 : vector<8x1xi32>
    %c8_i32_6 = arith.constant 8 : i32
    %27 = vector.broadcast %c8_i32_6 : i32 to vector<8x1xi32>
    %28 = arith.cmpi slt, %26, %27 : vector<8x1xi32>
    %cst_7 = arith.constant 0.000000e+00 : f32
    %29 = vector.broadcast %cst_7 : f32 to vector<8x1xf32>
    %30 = arith.select %28, %22, %29 : vector<8x1xi1>, vector<8x1xf32>
    %31 = vector.shape_cast %30 : vector<8x1xf32> to vector<1x8x1xf32>
    %cst_8 = arith.constant dense<0.000000e+00> : vector<1xf32>
    %32 = vector.multi_reduction <add>, %31, %cst_8 [1, 2] : vector<1x8x1xf32> to vector<1xf32>
    %33 = vector.shape_cast %32 : vector<1xf32> to vector<1x1x1xf32>
    %34 = vector.extract %33[0, 0, 0] : f32 from vector<1x1x1xf32>
    %35 = tpu.iota {dimensions = array<i32: 0>} : vector<8x128xi32>
    %36 = tpu.iota {dimensions = array<i32: 1>} : vector<8x128xi32>
    %c0_i32 = arith.constant 0 : i32
    %37 = vector.broadcast %c0_i32 : i32 to vector<8x128xi32>
    %38 = arith.cmpi eq, %35, %37 : vector<8x128xi32>
    %c0_i32_9 = arith.constant 0 : i32
    %39 = vector.broadcast %c0_i32_9 : i32 to vector<8x128xi32>
    %40 = arith.cmpi eq, %36, %39 : vector<8x128xi32>
    %41 = arith.andi %38, %40 : vector<8x128xi1>
    %cst_10 = arith.constant 0.000000e+00 : f32
    %42 = vector.broadcast %34 : f32 to vector<8x128xf32>
    %43 = vector.broadcast %cst_10 : f32 to vector<8x128xf32>
    %44 = arith.select %41, %42, %43 : vector<8x128xi1>, vector<8x128xf32>
    %c0_11 = arith.constant 0 : index
    %c0_12 = arith.constant 0 : index
    %45 = vector.load %arg2[%c0_11, %c0_12] : memref<8x128xf32, #tpu.memory_space<vmem>>, vector<8x128xf32>
    tpu.vector_store %arg2[%c0_11, %c0_12], %44 {strides = array<i32>} : memref<8x128xf32, #tpu.memory_space<vmem>>, vector<8x128xf32>,
    return
  }
  func.func @transform_0(%arg0: i32) -> (i32, i32) {
    %c0_i32 = arith.constant 0 : i32
    %c0_i32_0 = arith.constant 0 : i32
    return %arg0, %c0_i32 : i32, i32
  }
  func.func @transform_1(%arg0: i32) -> (i32, i32) {
    %c0_i32 = arith.constant 0 : i32
    %c0_i32_0 = arith.constant 0 : i32
    return %arg0, %c0_i32 : i32, i32
  }
}

</mosaic_0001>

<bundles_post_ra>
// kernel: tpu_custom_call.1
= control target key start
LH: loop header
LB: loop body
LE: loop exit
PB: predicated region body
PF: predicated region fallthrough
CT: control target
= control target key end

     0   :  { %6 = vsyncpa [#allocation3], 0  ;;  %s162_s0 = inlined_call_operand.hbm [shape: f32[8,384], index: 0, kind: input, shape index: {}]   ;;  %s163_s1 = inlined_call_operand.hbm [shape: f32[8,128], index: 1, kind: output, shape index: {}]  }
   0x1   :  { %7 = vsyncpa [#allocation4], 0  ;;  %s144_s6 = smov [#allocation2]  }
   0x2   :  { %s14_s7 = sshll.u32 %s144_s6, 4  ;;  %s15_s7 = int_to_ptr.vmem [resolvable:$true] %s14_s7 }
   0x3   :  { %s108_s8 = scalar_lea.vmem %s15_s7, 384  ;;  %p113_p1 = scmp.lt.s32.totalorder %s15_s7, %s15_s7 }
   0x4   :  { %p109_p0 = scmp.ne.s32.totalorder %s15_s7, %s108_s8  ;;  %p114_p2 = scmp.lt.s32.totalorder %s108_s8, %s108_s8 }
   0x6   :  { %p115_p3 = por %p114_p2, %p113_p1 }
   0x8   :  { %p116_p4 = pnand %p115_p3, %p109_p0 }
   0xa   :  { %119 = shalt.err (!%p116_p4)
}
   0xb   :  { %17 = dma.hbm_to_vmem [thread:$0]  %s162_s0, 384, %s15_s7, [#allocation3]  }
   0xc   :  { %140 = dma.done.wait [#allocation3], 384  }
   0xd   :  { %141 = vsyncadd [#allocation3], 4294966912  ;;  %v21_v0 = vld [vmem:[#allocation2] sm:$0xff]  ;;  %v22_v1 = vld [vmem:[#allocation2 + $0x8] sm:$0xff]  ;;  %vm58_vm4 = vcmask 7168   ;;  %v52_v32 = vlaneseq  ;;  %s145_s0 = smov [#allocation5]  }
   0xe   :  { %v23_v2 = vld [vmem:[#allocation2 + $0x10] sm:$0xff]  ;;  %v24_v3 = vsub.f32 %v21_v0, %v22_v1  ;;  %s83_s11 = sshll.u32 %s145_s0, 4  ;;  %s84_s11 = int_to_ptr.vmem [resolvable:$true] %s83_s11 }
   0xf   :  { %v25_v4 = vsub.f32 %v21_v0, %v23_v2  ;;  %v53_v33 = vshrl.u32 %v52_v32, 7  ;;  %v70_v34 = vand.u32 127, %v52_v32  ;;  %s120_s13 = scalar_lea.vmem %s84_s11, 128  ;;  %p125_p6 = scmp.lt.s32.totalorder %s84_s11, %s84_s11 }
  0x10   :  { %v26_v5 = vmul.f32 %v24_v3, %v24_v3  ;;  %p121_p5 = scmp.ne.s32.totalorder %s84_s11, %s120_s13  ;;  %p126_p7 = scmp.lt.s32.totalorder %s120_s13, %s120_s13 }
  0x11   :  { %v29_v6 = vmul.f32 %v25_v4, %v25_v4  ;;  %vm71_vm5 = vcmp.eq.s32.totalorder %v53_v33, 0  ;;  %vm72_vm6 = vcmp.eq.s32.totalorder %v70_v34, 0 }
  0x12   :  { %27 = vadd.xlane.f32.xlu0 %v26_v5  ;;  %vm73_vm7 = vmand %vm71_vm5, %vm72_vm6  ;;  %p127_p8 = por %p126_p7, %p125_p6 }
  0x14   :  { %p128_p9 = pnand %p127_p8, %p121_p5 }
  0x16   :  { %30 = vadd.xlane.f32.xlu0 %v29_v6 }
  0x9b   :  { %v28_v7 = vpop.xlane.xlu0 %27 }
  0x9c   :  { %v32_v8 = vadd.f32 1e-06, %v28_v7 }
  0x9e   :  { %96 = vrsqrt.f32 %v32_v8  ;;  %vm35_vm0 = vcmp.eq.f32.partialorder %v32_v8, inf  ;;  %v38_v16 = vand.u32 2147483648, %v32_v8  ;;  %vm37_vm2 = vcmp.eq.f32.partialorder %v32_v8, 0.0 }
  0x9f   :  { %v31_v9 = vpop.xlane.xlu0 %30 }
  0xa0   :  { %v40_v10 = vadd.f32 1e-06, %v31_v9 }
  0xa2   :  { %98 = vrsqrt.f32 %v40_v10  ;;  %vm43_vm1 = vcmp.eq.f32.partialorder %v40_v10, inf  ;;  %v46_v17 = vand.u32 2147483648, %v40_v10  ;;  %vm45_vm3 = vcmp.eq.f32.partialorder %v40_v10, 0.0 }
  0xab   :  { %v97_v11 = vpop.eup %96 }
  0xac   :  { %v34_v12 = vmul.f32 %v97_v11, %v32_v8 }
  0xae   :  { %v36_v14 = vsel %vm35_vm0, %v32_v8, %v34_v12 }
  0xaf   :  { %v99_v13 = vpop.eup %98  ;;  %v39_v19 = vsel %vm37_vm2, %v38_v16, %v36_v14 }
  0xb0   :  { %v42_v15 = vmul.f32 %v99_v13, %v40_v10 }
  0xb2   :  { %v44_v18 = vsel %vm43_vm1, %v40_v10, %v42_v15 }
  0xb3   :  { %v47_v20 = vsel %vm45_vm3, %v46_v17, %v44_v18 }
  0xb4   :  { %v48_v21 = vsub.f32 %v39_v19, %v47_v20 }
  0xb6   :  { %v49_v22 = vadd.f32 2.0, %v48_v21 }
  0xb8   :  { %v50_v23 = vmax.f32 %v49_v22, 0.0 }
  0xba   :  { %v59_v24 = vsel %vm58_vm4, %v50_v23, 0.0 }
  0xbb   :  { %60 = vadd.xlane.f32.xlu1 %v59_v24 }
 0x144   :  { %v61_v25 = vpop.xlane.xlu1 %60 }
 0x145   :  { %v62_v26 = vrot.slane %v61_v25, 4 }
 0x147   :  { %v63_v27 = vadd.f32 %v62_v26, %v61_v25 }
 0x149   :  { %v64_v28 = vrot.slane %v63_v27, 2 }
 0x14b   :  { %v65_v29 = vadd.f32 %v64_v28, %v63_v27 }
 0x14d   :  { %v66_v30 = vrot.slane %v65_v29, 1 }
 0x14f   :  { %v67_v31 = vadd.f32 %v66_v30, %v65_v29 }
 0x151   :  { %92 = vpush %v67_v31 }
 0x182   :  { %s93_s12 = spop %92 }
 0x183   :  { %v74_v35 = vstv %s93_s12 }
 0x184   :  { %v75_v36 = vsel %vm73_vm7, %v74_v35, 0.0 }
 0x185   :  { %76 = vst [vmem:[#allocation5] sm:$0xff] %v75_v36 }
 0x186   :  { %131 = shalt.err (!%p128_p9)
}
 0x187   :  { %86 = dma.vmem_to_hbm [thread:$0]  %s84_s11, 128, %s163_s1, [#allocation4]  }
 0x188   :  { %142 = dma.done.wait [#allocation4], 128  }
 0x189   :  { %143 = vsyncadd [#allocation4], 4294967168 }
 0x18a   :  { %90 = vsyncpa [#allocation3], 1 }
 0x18b   :  { %91 = vsyncpa [#allocation4], 1 }

</bundles_post_ra>
